<compile_context>
chip_gen: v7x
topology: tpu7x:2x2x1
jax: 0.10.0
libtpu: 0.0.40
codegen_flags: <defaults>
</compile_context>

<pallas_src>
import math
from functools import lru_cache

import jax
import jax.numpy as jnp
from jax.experimental import pallas as pl
from jax.experimental.pallas import tpu as pltpu

_LANE = 128
_MIB = 1024 * 1024


# ----------------------------- kernels ---------------------------------------
def _relu_kernel(x_ref, o_ref):
    x = x_ref[...]
    o_ref[...] = jnp.maximum(x, jnp.zeros_like(x))


def _prelu_scalar_kernel(a_ref, x_ref, o_ref):
    # a_ref: (1,) float32 scalar in SMEM; x_ref / o_ref: (tr, tc) VMEM tiles.
    x = x_ref[...]
    a = a_ref[0]
    neg = (a * x.astype(jnp.float32)).astype(o_ref.dtype)
    o_ref[...] = jnp.where(x >= 0, x, neg)


def _prelu_rows_kernel(x_ref, a_ref, o_ref):
    # x_ref / o_ref: (tr, tc); a_ref: (tr, 1) per-row slope, broadcast over lanes.
    x = x_ref[...]
    a = a_ref[...]
    o_ref[...] = jnp.where(x >= 0, x, a * x)


# ----------------------------- chip / tiling helpers --------------------------
@lru_cache(maxsize=1)
def _chip_params():
    """Returns (tile_budget_bytes, vmem_limit_bytes, parallel_cores, col_cap)."""
    kind = ""
    try:
        kind = jax.devices()[0].device_kind.lower()
    except Exception:
        pass
    if "v7" in kind or "tpu7" in kind:
        # v7x: ~3.2 TB/s per-TC HBM -> bigger tiles amortize per-step overhead.
        # 64 MiB physical VMEM/TC; keep double-buffered in+out under 48 MiB.
        return 8 * _MIB, 48 * _MIB, 2, 4096
    if "v6" in kind:
        return 4 * _MIB, 64 * _MIB, 1, 2048
    # v5e / unknown: modest tiles, but raise past the 16 MiB scoped default.
    return 2 * _MIB, 32 * _MIB, 1, 2048


def _sublane_granule(itemsize):
    # Sub-32-bit dtypes pack rows along sublanes: f32 -> 8, bf16 -> 16, int8 -> 32.
    return max(8, 32 // max(1, itemsize))


def _tile_2d(rows, cols, itemsize):
    budget, _, cores, col_cap = _chip_params()
    granule = _sublane_granule(itemsize)

    # Lane-dense column tile (multiple of 128) or full dim when it is short.
    tc = cols if cols <= _LANE else min((cols // _LANE) * _LANE, col_cap)

    # Row tile so the input tile is ~budget bytes; multiple of the sublane
    # packing granule, or the full dim (always legal).
    budget_rows = max(1, budget // max(1, tc * itemsize))
    if rows <= budget_rows:
        tr = rows
    else:
        tr = max(granule, (budget_rows // granule) * granule)

    # Guarantee >= 2 blocks per TensorCore on multi-core chips (v7x) for
    # non-trivial tensors so "parallel" dimension semantics can shard the grid.
    if cores > 1 and rows * cols * itemsize > 4 * _MIB:
        min_blocks = 2 * cores
        while pl.cdiv(rows, tr) * pl.cdiv(cols, tc) < min_blocks and tr > granule:
            tr = max(granule, ((tr // 2) // granule) * granule)
        while pl.cdiv(rows, tr) * pl.cdiv(cols, tc) < min_blocks and tc > _LANE:
            tc = max(_LANE, ((tc // 2) // _LANE) * _LANE)
    return tr, tc


def _compiler_params():
    _, vmem_limit, _, _ = _chip_params()
    return pltpu.CompilerParams(
        dimension_semantics=("parallel", "parallel"),
        vmem_limit_bytes=vmem_limit)


def _lane_dense_2d(x):
    """Flatten x into a 2D slab whose last dim is a multiple of 128 (or the full
    flat size if tiny). Pads only when no multiple-of-128 divisor exists.
    Returns (x2d, total_elems)."""
    total = math.prod(x.shape)
    flat = x.reshape(total)
    if total <= _LANE:
        return flat.reshape(1, total), total
    _, _, _, col_cap = _chip_params()
    max_cols = min(col_cap, (total // _LANE) * _LANE)
    for cols in range(max_cols, _LANE - 1, -_LANE):
        if total % cols == 0:
            return flat.reshape(total // cols, cols), total
    # No clean divisor: pad the flat view so every store stays an unmasked
    # full-lane vst (pure layout plumbing; one extra pad/slice in the wrapper).
    cols = min(1024, max_cols)
    padded = pl.cdiv(total, cols) * cols
    flat = jnp.pad(flat, (0, padded - total))
    return flat.reshape(padded // cols, cols), total


# ----------------------------- pallas_call wrappers ---------------------------
def _relu_2d(x2d):
    rows, cols = x2d.shape
    tr, tc = _tile_2d(rows, cols, x2d.dtype.itemsize)
    grid = (pl.cdiv(rows, tr), pl.cdiv(cols, tc))
    return pl.pallas_call(
        _relu_kernel,
        out_shape=jax.ShapeDtypeStruct((rows, cols), x2d.dtype),
        grid=grid,
        in_specs=[pl.BlockSpec((tr, tc), lambda i, j: (i, j))],
        out_specs=pl.BlockSpec((tr, tc), lambda i, j: (i, j)),
        compiler_params=_compiler_params(),
    )(x2d)


def _prelu_scalar_2d(x2d, alpha_scalar):
    rows, cols = x2d.shape
    tr, tc = _tile_2d(rows, cols, x2d.dtype.itemsize)
    grid = (pl.cdiv(rows, tr), pl.cdiv(cols, tc))
    a = jnp.asarray(alpha_scalar, dtype=jnp.float32).reshape(1)
    return pl.pallas_call(
        _prelu_scalar_kernel,
        out_shape=jax.ShapeDtypeStruct((rows, cols), x2d.dtype),
        grid=grid,
        in_specs=[
            pl.BlockSpec(memory_space=pltpu.MemorySpace.SMEM),  # alpha scalar
            pl.BlockSpec((tr, tc), lambda i, j: (i, j)),
        ],
        out_specs=pl.BlockSpec((tr, tc), lambda i, j: (i, j)),
        compiler_params=_compiler_params(),
    )(a, x2d)


def _prelu_per_channel(x, alpha_c):
    """x: (N, C, H, W); alpha_c: (C,) per-channel slope."""
    n, c, h, w = x.shape
    hw = h * w
    rows = n * c
    x2 = x.reshape(rows, hw)
    # Per-row slope column (N*C, 1): row r = batch*C + channel -> alpha_c[r % C].
    a_col = jnp.tile(alpha_c.astype(x.dtype), n).reshape(rows, 1)

    tr, tc = _tile_2d(rows, hw, x.dtype.itemsize)
    grid = (pl.cdiv(rows, tr), pl.cdiv(hw, tc))
    out2 = pl.pallas_call(
        _prelu_rows_kernel,
        out_shape=jax.ShapeDtypeStruct((rows, hw), x.dtype),
        grid=grid,
        in_specs=[
            pl.BlockSpec((tr, tc), lambda i, j: (i, j)),
            pl.BlockSpec((tr, 1), lambda i, j: (i, 0)),
        ],
        out_specs=pl.BlockSpec((tr, tc), lambda i, j: (i, j)),
        compiler_params=_compiler_params(),
    )(x2, a_col)
    return out2.reshape(n, c, h, w)


# ----------------------------- module port ------------------------------------
class ActFunc:
    """JAX/Pallas port of midl.layers.ActFunc.

    activation in {"ReLU", "PReLU", "None"}.
    PReLU weight is initialized to 0.25 (PyTorch default), shape
    (num_parameters,); num_parameters must be 1 or equal to C.
    """

    def __init__(self, activation, **kwargs):
        if "num_parameters" not in kwargs:
            kwargs["num_parameters"] = 1
        if activation not in ("ReLU", "PReLU", "None"):
            raise KeyError(activation)
        self.activation = activation
        self.num_parameters = kwargs["num_parameters"]
        # PyTorch nn.PReLU default init = 0.25 for every parameter.
        self.prelu_weight = jnp.full((self.num_parameters,), 0.25, dtype=jnp.float32)

    def __call__(self, x):
        # x: (N, C, H, W) NCHW
        n, c, h, w = x.shape

        if self.activation == "None":
            # Identity: no kernel launch, no HBM traffic.
            return x

        # TODO(synk): for peak perf, fuse this activation into the producing
        # conv/matmul epilogue (or donate + input_output_alias the buffer);
        # a standalone pass is capped at the read+write HBM roofline.

        if self.activation == "ReLU":
            x2d, total = _lane_dense_2d(x)
            y2d = _relu_2d(x2d)
            return y2d.reshape(-1)[:total].reshape(n, c, h, w)

        # PReLU
        if self.num_parameters == 1:
            # Scalar-alpha fast path: identical streaming layout to ReLU.
            x2d, total = _lane_dense_2d(x)
            y2d = _prelu_scalar_2d(x2d, self.prelu_weight[0])
            return y2d.reshape(-1)[:total].reshape(n, c, h, w)

        if self.num_parameters != c:
            raise ValueError(
                f"PReLU num_parameters ({self.num_parameters}) must be 1 or "
                f"equal to the channel count ({c}).")
        return _prelu_per_channel(x, self.prelu_weight)


# ----------------------------- demo / check ----------------------------------
if __name__ == "__main__":
    key = jax.random.PRNGKey(0)
    N, C, H, W = 2, 4, 16, 16
    x = jax.random.normal(key, (N, C, H, W), dtype=jnp.float32)

    # ReLU
    relu_mod = ActFunc("ReLU")
    y_relu = jax.block_until_ready(relu_mod(x))
    ref_relu = jnp.maximum(x, 0.0)
    assert y_relu.shape == x.shape
    assert jnp.allclose(y_relu, ref_relu, atol=1e-6)

    # PReLU (default single parameter, init 0.25) -> scalar SMEM fast path
    prelu_mod = ActFunc("PReLU")
    y_prelu = jax.block_until_ready(prelu_mod(x))
    ref_prelu = jnp.where(x >= 0, x, 0.25 * x)
    assert jnp.allclose(y_prelu, ref_prelu, atol=1e-6)

    # PReLU with per-channel parameters (all init to 0.25 -> same reference)
    prelu_c = ActFunc("PReLU", num_parameters=C)
    y_prelu_c = jax.block_until_ready(prelu_c(x))
    assert jnp.allclose(y_prelu_c, ref_prelu, atol=1e-6)

    # Identity (no kernel launched)
    id_mod = ActFunc("None")
    y_id = jax.block_until_ready(id_mod(x))
    assert jnp.allclose(y_id, x)

    print("KERNEL_OK")
</pallas_src>

<mosaic_0001>
module attributes {stable_mosaic.version = 11 : i64} {
  func.func @_relu_kernel(%arg0: i32, %arg1: i32, %arg2: memref<1x2048xf32, #tpu.memory_space<vmem>>, %arg3: memref<1x2048xf32, #tpu.memory_space<vmem>>) attributes {dimension_semantics = [#tpu.dimension_semantics<parallel>, #tpu.dimension_semantics<parallel>], iteration_bounds = array<i64: 1, 1>, scalar_prefetch = 0 : i64, scratch_operands = 0 : i64, tpu.core_type = #tpu.core_type<tc>, window_params = [{transform_indices = @transform_0, window_bounds = array<i64: 1, 2048>}, {transform_indices = @transform_1, window_bounds = array<i64: 1, 2048>}]} {
    %c0 = arith.constant 0 : index
    %c0_0 = arith.constant 0 : index
    %0 = vector.load %arg2[%c0, %c0_0] : memref<1x2048xf32, #tpu.memory_space<vmem>>, vector<1x2048xf32>
    %cst = arith.constant 0.000000e+00 : f32
    %1 = vector.broadcast %cst : f32 to vector<1x2048xf32>
    %2 = arith.maximumf %0, %1 : vector<1x2048xf32>
    %c0_1 = arith.constant 0 : index
    %c0_2 = arith.constant 0 : index
    %3 = vector.load %arg3[%c0_1, %c0_2] : memref<1x2048xf32, #tpu.memory_space<vmem>>, vector<1x2048xf32>
    tpu.vector_store %arg3[%c0_1, %c0_2], %2 {strides = array<i32>} : memref<1x2048xf32, #tpu.memory_space<vmem>>, vector<1x2048xf32>,
    return
  }
  func.func @transform_0(%arg0: i32, %arg1: i32) -> (i32, i32) {
    %c0_i32 = arith.constant 0 : i32
    return %arg0, %arg1 : i32, i32
  }
  func.func @transform_1(%arg0: i32, %arg1: i32) -> (i32, i32) {
    %c0_i32 = arith.constant 0 : i32
    return %arg0, %arg1 : i32, i32
  }
}

</mosaic_0001>

<bundles_post_ra>
// kernel: tpu_custom_call.1
= control target key start
LH: loop header
LB: loop body
LE: loop exit
PB: predicated region body
PF: predicated region fallthrough
CT: control target
= control target key end

     0   :  { %6 = vsyncpa [#allocation3], 0  ;;  %s128_s0 = inlined_call_operand.hbm [shape: f32[1,2048], index: 0, kind: input, shape index: {}]   ;;  %s129_s1 = inlined_call_operand.hbm [shape: f32[1,2048], index: 1, kind: output, shape index: {}]  }
   0x1   :  { %7 = vsyncpa [#allocation4], 0  ;;  %s92_s6 = smov [#allocation2]   ;;  %s44_s10 = scalar_lea.hbm %s128_s0, 256 }
   0x2   :  { %s14_s7 = sshll.u32 %s92_s6, 4  ;;  %p45_p0 = scmp.ne.s32.totalorder %s128_s0, %s44_s10  ;;  %s15_s7 = int_to_ptr.vmem [resolvable:$true] %s14_s7 }
   0x3   :  { %p48_p1 = scmp.lt.u32.totalorder %s44_s10, %s128_s0 }
   0x5   :  { %p50_p2 = pnand %p48_p1, %p45_p0 }
   0x7   :  { %53 = shalt.err (!%p50_p2)
}
   0x8   :  { %s54_s15 = scalar_lea.vmem %s15_s7, 256  ;;  %p59_p4 = scmp.lt.s32.totalorder %s15_s7, %s15_s7 }
   0x9   :  { %p55_p3 = scmp.ne.s32.totalorder %s15_s7, %s54_s15  ;;  %p60_p5 = scmp.lt.s32.totalorder %s54_s15, %s54_s15 }
   0xb   :  { %p61_p6 = por %p60_p5, %p59_p4 }
   0xd   :  { %p62_p7 = pnand %p61_p6, %p55_p3 }
   0xf   :  { %65 = shalt.err (!%p62_p7)
}
  0x10   :  { %17 = dma.hbm_to_vmem [thread:$0]  %s128_s0, 256, %s15_s7, [#allocation3]  }
  0x11   :  { %88 = dma.done.wait [#allocation3], 256  }
  0x12   :  { %89 = vsyncadd [#allocation3], 4294967040  ;;  %s93_s18 = smov [#allocation5]   ;;  %v21_v0 = vld [vmem:[#allocation2] sm:$0xff]  ;;  %v22_v1 = vld [vmem:[#allocation2 + $0x8] sm:$0xff] }
  0x13   :  { %s33_s19 = sshll.u32 %s93_s18, 4  ;;  %v23_v2 = vmax.f32 %v21_v0, 0.0  ;;  %v24_v3 = vmax.f32 %v22_v1, 0.0  ;;  %s34_s19 = int_to_ptr.vmem [resolvable:$true] %s33_s19 }
  0x14   :  { %s66_s20 = scalar_lea.vmem %s34_s19, 256  ;;  %p71_p9 = scmp.lt.s32.totalorder %s34_s19, %s34_s19 }
  0x15   :  { %25 = vst [vmem:[#allocation5] sm:$0xff] %v23_v2  ;;  %26 = vst [vmem:[#allocation5 + $0x8] sm:$0xff] %v24_v3  ;;  %p67_p8 = scmp.ne.s32.totalorder %s34_s19, %s66_s20  ;;  %p72_p10 = scmp.lt.s32.totalorder %s66_s20, %s66_s20 }
  0x17   :  { %p73_p11 = por %p72_p10, %p71_p9 }
  0x19   :  { %p74_p12 = pnand %p73_p11, %p67_p8 }
  0x1b   :  { %77 = shalt.err (!%p74_p12)
}
  0x1c   :  { %s78_s22 = scalar_lea.hbm %s129_s1, 256 }
  0x1d   :  { %p79_p13 = scmp.ne.s32.totalorder %s129_s1, %s78_s22  ;;  %p82_p0 = scmp.lt.u32.totalorder %s78_s22, %s129_s1 }
  0x1f   :  { %p84_p1 = pnand %p82_p0, %p79_p13 }
  0x21   :  { %87 = shalt.err (!%p84_p1)
}
  0x22   :  { %36 = dma.vmem_to_hbm [thread:$0]  %s34_s19, 256, %s129_s1, [#allocation4]  }
  0x23   :  { %90 = dma.done.wait [#allocation4], 256  }
  0x24   :  { %91 = vsyncadd [#allocation4], 4294967040 }
  0x25   :  { %40 = vsyncpa [#allocation3], 1 }
  0x26   :  { %41 = vsyncpa [#allocation4], 1 }

</bundles_post_ra>
